<compile_context>
chip_gen: v6e
topology: v6e:2x2x1
jax: 0.10.0
libtpu: 0.0.40
codegen_flags: <defaults>
</compile_context>

<pallas_src>
import functools

import jax
import jax.numpy as jnp
from jax.experimental import pallas as pl
from jax.experimental.pallas import tpu as pltpu

LEAKY_SLOPE = 0.01  # torch.nn.LeakyReLU default negative_slope


def _round_up(x, m):
    return ((x + m - 1) // m) * m


def _resident_spec(shape):
    """Full-array block with a constant block index -> stays VMEM-resident."""
    ndim = len(shape)
    return pl.BlockSpec(tuple(shape), lambda i, _nd=ndim: (0,) * _nd)


def _mlp_kernel(*refs, num_layers):
    # refs = (xT_ref, w0, b0, w1, b1, ..., w_{L-1}, b_{L-1}, out_ref)
    xT_ref = refs[0]
    out_ref = refs[-1]
    param_refs = refs[1:-1]

    h = xT_ref[...].astype(jnp.float32)                      # (in_dim, TILE_B)
    for i in range(num_layers):
        w = param_refs[2 * i][...].astype(jnp.float32)       # (out_i, in_i) PyTorch layout
        b = param_refs[2 * i + 1][...].astype(jnp.float32)   # (out_i, 1) -> broadcasts on lanes
        # y^T = W @ h + b : batch stays on the 128-lane axis throughout.
        h = jnp.dot(w, h, preferred_element_type=jnp.float32) + b
        if i < num_layers - 1:
            h = jnp.where(h > 0, h, LEAKY_SLOPE * h)          # LeakyReLU
    out_ref[...] = h.astype(out_ref.dtype)                    # (out_dim, TILE_B), lane-dense


def mlp_forward(x, weights, biases, *, max_tile_b=512):
    """Fused MLP forward.

    x:          (B, in_dim)
    weights[i]: (out_i, in_i)   -- PyTorch nn.Linear layout
    biases[i]:  (out_i,)
    returns     (B, out_dim)
    """
    num_layers = len(weights)
    B, in_dim = x.shape
    out_dim = weights[-1].shape[0]

    # Batch tile: multiple of 128 (lane width), capped so the double-buffered
    # working set stays far below the 32 MiB scoped-VMEM default (v7x: 64 MiB total).
    tile_b = min(max_tile_b, _round_up(max(B, 1), 128))
    b_pad = _round_up(max(B, 1), tile_b)
    grid = (b_pad // tile_b,)

    # Lane-dense layout: batch on the last (lane) axis. Padding columns are
    # sliced off after the call.
    xT = jnp.pad(x.T, ((0, 0), (0, b_pad - B)))

    args = [xT]
    in_specs = [pl.BlockSpec((in_dim, tile_b), lambda i: (0, i))]
    for w, b in zip(weights, biases):
        b2d = b.reshape(-1, 1)                    # (out_i, 1)
        args += [w, b2d]
        in_specs += [_resident_spec(w.shape), _resident_spec(b2d.shape)]

    out_spec = pl.BlockSpec((out_dim, tile_b), lambda i: (0, i))

    yT = pl.pallas_call(
        functools.partial(_mlp_kernel, num_layers=num_layers),
        grid=grid,
        in_specs=in_specs,
        out_specs=out_spec,
        out_shape=jax.ShapeDtypeStruct((out_dim, b_pad), x.dtype),
        compiler_params=pltpu.CompilerParams(
            dimension_semantics=("parallel",)),   # v7x: split batch over both TCs
    )(*args)

    return yT[:, :B].T                            # (B, out_dim)


def model_0_forward(x, weights, biases):
    y = mlp_forward(x, weights, biases)
    return jnp.squeeze(y)  # torch.squeeze equivalent (wrapper glue)


def init_params(layer_size_list, key):
    """Deterministic init matching nn.Linear shapes (PyTorch (out, in) layout)."""
    weights, biases = [], []
    for i in range(len(layer_size_list) - 1):
        fan_in, fan_out = layer_size_list[i], layer_size_list[i + 1]
        key, wk, bk = jax.random.split(key, 3)
        limit = (6.0 / (fan_in + fan_out)) ** 0.5            # xavier_uniform_ bound
        w = jax.random.uniform(wk, (fan_out, fan_in), jnp.float32, -limit, limit)
        b_lim = 1.0 / (fan_in ** 0.5)                        # nn.Linear default bias init
        b = jax.random.uniform(bk, (fan_out,), jnp.float32, -b_lim, b_lim)
        weights.append(w)
        biases.append(b)
    return weights, biases


if __name__ == "__main__":
    # Small, module-consistent shapes:
    # nChannel=4, numSampleInput=16 -> flattened feature dim 64.
    nChannel = 4
    numSampleInput = 16
    layer_size_list = [nChannel * numSampleInput, 32, 16, 1]
    batch = 2

    key = jax.random.PRNGKey(0)
    key, xk = jax.random.split(key)
    x = jax.random.normal(xk, (batch, layer_size_list[0]), jnp.float32)

    weights, biases = init_params(layer_size_list, key)

    y = model_0_forward(x, weights, biases)
    y = jax.block_until_ready(y)

    # Reference check in plain JAX (same math, outside Pallas).
    h = x
    for i, (w, b) in enumerate(zip(weights, biases)):
        h = h @ w.T + b
        if i < len(weights) - 1:
            h = jnp.where(h > 0, h, LEAKY_SLOPE * h)
    ref = jnp.squeeze(h)
    assert y.shape == ref.shape, f"shape mismatch {y.shape} vs {ref.shape}"
    assert jnp.allclose(y, ref, atol=1e-5, rtol=1e-5), "mismatch vs reference"

    print("KERNEL_OK")
</pallas_src>

<mosaic_0001>
module attributes {stable_mosaic.version = 11 : i64} {
  func.func @_mlp_kernel(%arg0: i32, %arg1: memref<64x128xf32, #tpu.memory_space<vmem>>, %arg2: memref<32x64xf32, #tpu.memory_space<vmem>>, %arg3: memref<32x1xf32, #tpu.memory_space<vmem>>, %arg4: memref<16x32xf32, #tpu.memory_space<vmem>>, %arg5: memref<16x1xf32, #tpu.memory_space<vmem>>, %arg6: memref<1x16xf32, #tpu.memory_space<vmem>>, %arg7: memref<1x1xf32, #tpu.memory_space<vmem>>, %arg8: memref<1x128xf32, #tpu.memory_space<vmem>>) attributes {dimension_semantics = [#tpu.dimension_semantics<parallel>], iteration_bounds = array<i64: 1>, scalar_prefetch = 0 : i64, scratch_operands = 0 : i64, tpu.core_type = #tpu.core_type<tc>, window_params = [{transform_indices = @transform_0, window_bounds = array<i64: 64, 128>}, {pipeline_mode = #tpu.pipeline_mode<synchronous>, transform_indices = @transform_1, window_bounds = array<i64: 32, 64>}, {pipeline_mode = #tpu.pipeline_mode<synchronous>, transform_indices = @transform_2, window_bounds = array<i64: 32, 1>}, {pipeline_mode = #tpu.pipeline_mode<synchronous>, transform_indices = @transform_3, window_bounds = array<i64: 16, 32>}, {pipeline_mode = #tpu.pipeline_mode<synchronous>, transform_indices = @transform_4, window_bounds = array<i64: 16, 1>}, {pipeline_mode = #tpu.pipeline_mode<synchronous>, transform_indices = @transform_5, window_bounds = array<i64: 1, 16>}, {pipeline_mode = #tpu.pipeline_mode<synchronous>, transform_indices = @transform_6, window_bounds = array<i64: 1, 1>}, {transform_indices = @transform_7, window_bounds = array<i64: 1, 128>}]} {
    %c0 = arith.constant 0 : index
    %c0_0 = arith.constant 0 : index
    %0 = vector.load %arg1[%c0, %c0_0] : memref<64x128xf32, #tpu.memory_space<vmem>>, vector<64x128xf32>
    %c0_1 = arith.constant 0 : index
    %c0_2 = arith.constant 0 : index
    %1 = vector.load %arg2[%c0_1, %c0_2] : memref<32x64xf32, #tpu.memory_space<vmem>>, vector<32x64xf32>
    %c0_3 = arith.constant 0 : index
    %c0_4 = arith.constant 0 : index
    %2 = vector.load %arg3[%c0_3, %c0_4] : memref<32x1xf32, #tpu.memory_space<vmem>>, vector<32x1xf32>
    %cst = arith.constant dense<0.000000e+00> : vector<32x128xf32>
    %3 = tpu.matmul %1, %0, %cst {dimension_numbers = #tpu.dot_dimension_numbers<[1], [0], [0], [1], [0, 0, 1, 1], [], []>} : vector<32x64xf32>, vector<64x128xf32>, vector<32x128xf32> -> vector<32x128xf32>
    %4 = vector.broadcast %2 : vector<32x1xf32> to vector<32x128xf32>
    %5 = arith.addf %3, %4 : vector<32x128xf32>
    %cst_5 = arith.constant 0.000000e+00 : f32
    %6 = vector.broadcast %cst_5 : f32 to vector<32x128xf32>
    %7 = arith.cmpf ogt, %5, %6 : vector<32x128xf32>
    %cst_6 = arith.constant 0.00999999977 : f32
    %8 = vector.broadcast %cst_6 : f32 to vector<32x128xf32>
    %9 = arith.mulf %8, %5 : vector<32x128xf32>
    %10 = arith.select %7, %5, %9 : vector<32x128xi1>, vector<32x128xf32>
    %c0_7 = arith.constant 0 : index
    %c0_8 = arith.constant 0 : index
    %11 = vector.load %arg4[%c0_7, %c0_8] : memref<16x32xf32, #tpu.memory_space<vmem>>, vector<16x32xf32>
    %c0_9 = arith.constant 0 : index
    %c0_10 = arith.constant 0 : index
    %12 = vector.load %arg5[%c0_9, %c0_10] : memref<16x1xf32, #tpu.memory_space<vmem>>, vector<16x1xf32>
    %cst_11 = arith.constant dense<0.000000e+00> : vector<16x128xf32>
    %13 = tpu.matmul %11, %10, %cst_11 {dimension_numbers = #tpu.dot_dimension_numbers<[1], [0], [0], [1], [0, 0, 1, 1], [], []>} : vector<16x32xf32>, vector<32x128xf32>, vector<16x128xf32> -> vector<16x128xf32>
    %14 = vector.broadcast %12 : vector<16x1xf32> to vector<16x128xf32>
    %15 = arith.addf %13, %14 : vector<16x128xf32>
    %cst_12 = arith.constant 0.000000e+00 : f32
    %16 = vector.broadcast %cst_12 : f32 to vector<16x128xf32>
    %17 = arith.cmpf ogt, %15, %16 : vector<16x128xf32>
    %cst_13 = arith.constant 0.00999999977 : f32
    %18 = vector.broadcast %cst_13 : f32 to vector<16x128xf32>
    %19 = arith.mulf %18, %15 : vector<16x128xf32>
    %20 = arith.select %17, %15, %19 : vector<16x128xi1>, vector<16x128xf32>
    %c0_14 = arith.constant 0 : index
    %c0_15 = arith.constant 0 : index
    %21 = vector.load %arg6[%c0_14, %c0_15] : memref<1x16xf32, #tpu.memory_space<vmem>>, vector<1x16xf32>
    %c0_16 = arith.constant 0 : index
    %c0_17 = arith.constant 0 : index
    %22 = vector.load %arg7[%c0_16, %c0_17] : memref<1x1xf32, #tpu.memory_space<vmem>>, vector<1x1xf32>
    %cst_18 = arith.constant dense<0.000000e+00> : vector<1x128xf32>
    %23 = tpu.matmul %21, %20, %cst_18 {dimension_numbers = #tpu.dot_dimension_numbers<[1], [0], [0], [1], [0, 0, 1, 1], [], []>} : vector<1x16xf32>, vector<16x128xf32>, vector<1x128xf32> -> vector<1x128xf32>
    %24 = vector.broadcast %22 : vector<1x1xf32> to vector<1x128xf32>
    %25 = arith.addf %23, %24 : vector<1x128xf32>
    %c0_19 = arith.constant 0 : index
    %c0_20 = arith.constant 0 : index
    %26 = vector.load %arg8[%c0_19, %c0_20] : memref<1x128xf32, #tpu.memory_space<vmem>>, vector<1x128xf32>
    tpu.vector_store %arg8[%c0_19, %c0_20], %25 {strides = array<i32>} : memref<1x128xf32, #tpu.memory_space<vmem>>, vector<1x128xf32>,
    return
  }
  func.func @transform_0(%arg0: i32) -> (i32, i32) {
    %c0_i32 = arith.constant 0 : i32
    %c0_i32_0 = arith.constant 0 : i32
    return %c0_i32, %arg0 : i32, i32
  }
  func.func @transform_1(%arg0: i32) -> (i32, i32) {
    %c0_i32 = arith.constant 0 : i32
    %c0_i32_0 = arith.constant 0 : i32
    %c0_i32_1 = arith.constant 0 : i32
    return %c0_i32, %c0_i32_0 : i32, i32
  }
  func.func @transform_2(%arg0: i32) -> (i32, i32) {
    %c0_i32 = arith.constant 0 : i32
    %c0_i32_0 = arith.constant 0 : i32
    %c0_i32_1 = arith.constant 0 : i32
    return %c0_i32, %c0_i32_0 : i32, i32
  }
  func.func @transform_3(%arg0: i32) -> (i32, i32) {
    %c0_i32 = arith.constant 0 : i32
    %c0_i32_0 = arith.constant 0 : i32
    %c0_i32_1 = arith.constant 0 : i32
    return %c0_i32, %c0_i32_0 : i32, i32
  }
  func.func @transform_4(%arg0: i32) -> (i32, i32) {
    %c0_i32 = arith.constant 0 : i32
    %c0_i32_0 = arith.constant 0 : i32
    %c0_i32_1 = arith.constant 0 : i32
    return %c0_i32, %c0_i32_0 : i32, i32
  }
  func.func @transform_5(%arg0: i32) -> (i32, i32) {
    %c0_i32 = arith.constant 0 : i32
    %c0_i32_0 = arith.constant 0 : i32
    %c0_i32_1 = arith.constant 0 : i32
    return %c0_i32, %c0_i32_0 : i32, i32
  }
  func.func @transform_6(%arg0: i32) -> (i32, i32) {
    %c0_i32 = arith.constant 0 : i32
    %c0_i32_0 = arith.constant 0 : i32
    %c0_i32_1 = arith.constant 0 : i32
    return %c0_i32, %c0_i32_0 : i32, i32
  }
  func.func @transform_7(%arg0: i32) -> (i32, i32) {
    %c0_i32 = arith.constant 0 : i32
    %c0_i32_0 = arith.constant 0 : i32
    return %c0_i32, %arg0 : i32, i32
  }
}

</mosaic_0001>

<bundles_post_ra>
// kernel: tpu_custom_call.1
= control target key start
LH: loop header
LB: loop body
LE: loop exit
PB: predicated region body
PF: predicated region fallthrough
CT: control target
= control target key end

     0   :  { %s614_s0 = inlined_call_operand.hbm [shape: f32[64,128], index: 0, kind: input, shape index: {}]   ;;  %s615_s1 = inlined_call_operand.vmem [shape: f32[32,64], index: 1, kind: input, shape index: {}]   ;;  %s616_s2 = inlined_call_operand.vmem [shape: f32[32,1], index: 2, kind: input, shape index: {}]   ;;  %s617_s3 = inlined_call_operand.vmem [shape: f32[16,32], index: 3, kind: input, shape index: {}]   ;;  %s618_s4 = inlined_call_operand.vmem [shape: f32[16,1], index: 4, kind: input, shape index: {}]   ;;  %s619_s5 = inlined_call_operand.vmem [shape: f32[1,16], index: 5, kind: input, shape index: {}]   ;;  %s620_s6 = inlined_call_operand.<no memory space> [shape: f32[1,1], index: 6, kind: input, shape index: {}]   ;;  %s621_s7 = inlined_call_operand.hbm [shape: f32[1,128], index: 7, kind: output, shape index: {}]  }
   0x1   :  { %v12_v0 = vstv %s620_s6 }
   0x2   :  { %13 = vst [vmem:[#allocation2] sm:$0x1] %v12_v0 }
   0x3   :  { %14 = vsyncpa [#allocation4], 0 }
   0x4   :  { %15 = vsyncpa [#allocation5], 0  ;;  %s513_s26 = smov [#allocation3]  }
   0x5   :  { %s21_s27 = sshll.u32 %s513_s26, 4  ;;  %s22_s27 = int_to_ptr.vmem [resolvable:$true] %s21_s27 }
   0x6   :  { %s477_s28 = scalar_lea.vmem %s22_s27, 1024  ;;  %p482_p1 = scmp.lt.s32.totalorder %s22_s27, %s22_s27 }
   0x7   :  { %p478_p0 = scmp.ne.s32.totalorder %s22_s27, %s477_s28  ;;  %p483_p2 = scmp.lt.s32.totalorder %s477_s28, %s477_s28 }
   0x9   :  { %p484_p3 = por %p483_p2, %p482_p1 }
   0xb   :  { %p485_p4 = pnand %p484_p3, %p478_p0 }
   0xd   :  { %488 = shalt.err (!%p485_p4)
}
   0xe   :  { %s514_s29 = smov 128   ;;  %s515_s30 = smov 8  }
   0xf   :  { %27 = dma.hbm_to_vmem [thread:$0]  %s614_s0, 1024, %s22_s27, [#allocation4], %s514_s29, %s514_s29, %s515_s30  }
  0x10   :  { %509 = dma.done.wait [#allocation4], 1024  }
  0x11   :  { %510 = vsyncadd [#allocation4], 4294966272  ;;  %v516_v1 = vmov 0   ;;  %v50_v2 = vld [vmem:[#allocation3 + $0x38] sm:$0xff]  ;;  %v49_v3 = vld [vmem:[#allocation3 + $0x30] sm:$0xff]  ;;  %vm79_vm0 = vcmask 523264   ;;  %v298_v55 = vlaneseq }
  0x12   :  { %467 = vset.pattern.permute.xlu0 %v516_v1  ;;  %468 = vset.pattern.permute.xlu1 %v516_v1  ;;  %v48_v4 = vld [vmem:[#allocation3 + $0x28] sm:$0xff]  ;;  %v51_v5 = vld [vmem:[%s615_s1] sm:$0xff]  ;;  %v58_v7 = vld [vmem:[%s616_s2 + $0x18] sm:$0xff]  ;;  %vm203_vm1 = vcmask 261120   ;;  %v517_v43 = vmov 0.0   ;;  %vm518_vm6 = vmmov 0  }
  0x13   :  { %420 = vmatprep.subr.mxu0 %v50_v2  ;;  %436 = vmatprep.mubr.msk.f32.mxu0 %vm79_vm0, %v51_v5  ;;  %v47_v6 = vld [vmem:[#allocation3 + $0x20] sm:$0xff]  ;;  %v46_v9 = vld [vmem:[#allocation3 + $0x18] sm:$0xff]  ;;  %v57_v10 = vld [vmem:[%s616_s2 + $0x10] sm:$0xff]  ;;  %vm302_vm9 = vcmask 130048   ;;  %v299_v56 = vshrl.u32 %v298_v55, 7  ;;  %s519_s30 = smov [#allocation6]  }
  0x14   :  { %421 = vmatpush3.msra.mxu0 %v50_v2  ;;  %76 = vperm.xlu0 %467, %v58_v7   ;;  %v56_v8 = vld [vmem:[%s616_s2 + $0x8] sm:$0xff]  ;;  %v55_v11 = vld [vmem:[%s616_s2] sm:$0xff]  ;;  %v45_v12 = vld [vmem:[#allocation3 + $0x10] sm:$0xff]  ;;  %s383_s8 = sshll.u32 %s519_s30, 4  ;;  %s384_s8 = int_to_ptr.vmem [resolvable:$true] %s383_s8 }
  0x15   :  { %422 = vmatprep.subr.mxu0 %v49_v3  ;;  %66 = vperm.xlu1 %468, %v56_v8   ;;  %v44_v13 = vld [vmem:[#allocation3 + $0x8] sm:$0xff]  ;;  %v191_v15 = vld [vmem:[%s618_s4] sm:$0xff]  ;;  %v54_v20 = vld [vmem:[%s615_s1 + $0x18] sm:$0xff]  ;;  %v300_v57 = vsub.s32 0, %v299_v56  ;;  %s489_s9 = scalar_lea.vmem %s384_s8, 16  ;;  %p494_p6 = scmp.lt.s32.totalorder %s384_s8, %s384_s8 }
  0x16   :  { %423 = vmatpush3.msra.mxu0 %v49_v3  ;;  %v192_v14 = vld [vmem:[%s618_s4 + $0x8] sm:$0xff]  ;;  %v292_v18 = vld [vmem:[#allocation2] sm:$0x1]  ;;  %v53_v19 = vld [vmem:[%s615_s1 + $0x10] sm:$0xff]  ;;  %p490_p5 = scmp.ne.s32.totalorder %s384_s8, %s489_s9 }
  0x17   :  { %424 = vmatprep.subr.mxu0 %v48_v4  ;;  %v43_v16 = vld [vmem:[#allocation3] sm:$0xff]  ;;  %v291_v53 = vld [vmem:[%s619_s5] sm:$0x1]  ;;  %s493_s5 = scalar_lea.vmem %s384_s8, 32 }
  0x18   :  { %425 = vmatpush3.msra.mxu0 %v48_v4  ;;  %71 = vperm.xlu0 %467, %v57_v10   ;;  %v52_v17 = vld [vmem:[%s615_s1 + $0x8] sm:$0xff]  ;;  %v189_v21 = vld [vmem:[%s617_s3] sm:$0xff]  ;;  %p495_p7 = scmp.lt.s32.totalorder %s493_s5, %s489_s9 }
  0x19   :  { %426 = vmatprep.subr.mxu0 %v47_v6  ;;  %61 = vperm.xlu1 %468, %v55_v11   ;;  %v190_v42 = vld [vmem:[%s617_s3 + $0x8] sm:$0xff] }
  0x1a   :  { %427 = vmatpush3.msra.mxu0 %v47_v6  ;;  %450 = vmatprep.mubr.msk.f32.mxu1 %vm203_vm1, %v189_v21  ;;  %p496_p8 = por %p495_p7, %p494_p6 }
  0x1b   :  { %428 = vmatprep.subr.mxu0 %v46_v9 }
  0x1c   :  { %429 = vmatpush3.msra.mxu0 %v46_v9  ;;  %200 = vperm.xlu0 %467, %v192_v14   ;;  %p497_p9 = pnand %p496_p8, %p490_p5 }
  0x1d   :  { %430 = vmatprep.subr.mxu0 %v45_v12  ;;  %195 = vperm.xlu1 %468, %v191_v15  }
  0x1e   :  { %431 = vmatpush3.msra.mxu0 %v45_v12 }
  0x1f   :  { %432 = vmatprep.subr.mxu0 %v44_v13 }
  0x20   :  { %433 = vmatpush3.msra.mxu0 %v44_v13  ;;  %295 = vperm.xlu0 %467, %v292_v18  }
  0x21   :  { %434 = vmatprep.subr.mxu0 %v43_v16 }
  0x22   :  { %435 = vmatpush3.msra.mxu0 %v43_v16 }
  0x23   :  { %437 = vmatmul.mubr.msk.f32.vlgmr.msra.gmra.mxu0 %vm79_vm0, %v52_v17 }
  0x24   :  { %439 = vmatprep.mubr.msk.f32.mxu0 %vm79_vm0, %v53_v19 }
  0x27   :  { %440 = vmatmul.mubr.msk.f32.gmra.mxu0 %vm79_vm0, %v54_v20 }
  0x8f   :  { %v77_v23 = vpop.permute.xlu0 %76 }
  0x90   :  { %v67_v22 = vpop.permute.xlu1 %66 }
  0x93   :  { %v72_v30 = vpop.permute.xlu0 %71 }
  0x94   :  { %v62_v26 = vpop.permute.xlu1 %61 }
  0x97   :  { %v201_v44 = vpop.permute.xlu0 %200 }
  0x98   :  { %v196_v47 = vpop.permute.xlu1 %195 }
  0x9b   :  { %v296_v58 = vpop.permute.xlu0 %295 }
  0x9c   :  { %v301_v59 = vrot.slane %v296_v58, %v300_v57 }
  0xe3   :  { %v438_v24 = vpop.f32.mrf.mxu0 }
  0xe4   :  { %v164_v28 = vadd.f32 %v438_v24, %v67_v22 }
  0xe5   :  { %v158_v25 = vpop.f32.mrf.mxu0 }
  0xe6   :  { %v159_v32 = vadd.f32 %v158_v25, %v62_v26  ;;  %v182_v35 = vmul.f32 0.01, %v164_v28  ;;  %vm178_vm4 = vcmp.gt.f32.partialorder %v164_v28, 0.0 }
  0xe7   :  { %v441_v27 = vpop.f32.mrf.mxu0 }
  0xe8   :  { %v174_v29 = vadd.f32 %v441_v27, %v77_v23  ;;  %v181_v38 = vmul.f32 0.01, %v159_v32  ;;  %vm177_vm5 = vcmp.gt.f32.partialorder %v159_v32, 0.0  ;;  %v186_v40 = vsel %vm178_vm4, %v164_v28, %v182_v35 }
  0xe9   :  { %v168_v31 = vpop.f32.mrf.mxu0 }
  0xea   :  { %v169_v33 = vadd.f32 %v168_v31, %v72_v30  ;;  %vm180_vm2 = vcmp.gt.f32.partialorder %v174_v29, 0.0  ;;  %v184_v34 = vmul.f32 0.01, %v174_v29  ;;  %v185_v41 = vsel %vm177_vm5, %v159_v32, %v181_v38 }
  0xec   :  { %v183_v36 = vmul.f32 0.01, %v169_v33  ;;  %v188_v37 = vsel %vm180_vm2, %v174_v29, %v184_v34  ;;  %vm179_vm3 = vcmp.gt.f32.partialorder %v169_v33, 0.0 }
  0xed   :  { %442 = vmatprep.subr.mxu1 %v188_v37 }
  0xee   :  { %443 = vmatpush3.msra.mxu1 %v188_v37  ;;  %v187_v39 = vsel %vm179_vm3, %v169_v33, %v183_v36 }
  0xef   :  { %444 = vmatprep.subr.mxu1 %v187_v39 }
  0xf0   :  { %445 = vmatpush3.msra.mxu1 %v187_v39 }
  0xf1   :  { %446 = vmatprep.subr.mxu1 %v186_v40 }
  0xf2   :  { %447 = vmatpush3.msra.mxu1 %v186_v40 }
  0xf3   :  { %448 = vmatprep.subr.mxu1 %v185_v41 }
  0xf4   :  { %449 = vmatpush3.msra.mxu1 %v185_v41 }
  0xf5   :  { %451 = vmatmul.mubr.msk.f32.vlgmr.msra.gmra.mxu1 %vm203_vm1, %v190_v42  ;;  %453 = vmatprep.subr.mxu1 %v517_v43 }
  0xf6   :  { %457 = vmatprep.mubr.msk.f32.mxu1 %vm518_vm6, %v517_v43 }
 0x1b5   :  { %v452_v45 = vpop.f32.mrf.mxu1 }
 0x1b6   :  { %v282_v46 = vadd.f32 %v452_v45, %v201_v44 }
 0x1b7   :  { %v276_v48 = vpop.f32.mrf.mxu1 }
 0x1b8   :  { %vm286_vm7 = vcmp.gt.f32.partialorder %v282_v46, 0.0  ;;  %v288_v49 = vmul.f32 0.01, %v282_v46  ;;  %v277_v50 = vadd.f32 %v276_v48, %v196_v47 }
 0x1ba   :  { %vm285_vm8 = vcmp.gt.f32.partialorder %v277_v50, 0.0  ;;  %v287_v51 = vmul.f32 0.01, %v277_v50  ;;  %v290_v52 = vsel %vm286_vm7, %v282_v46, %v288_v49 }
 0x1bb   :  { %454 = vmatpush3.msra.mxu1 %v290_v52 }
 0x1bc   :  { %455 = vmatprep.subr.mxu1 %v517_v43  ;;  %v289_v54 = vsel %vm285_vm8, %v277_v50, %v287_v51 }
 0x1bd   :  { %456 = vmatpush3.msra.mxu1 %v289_v54 }
 0x1be   :  { %458 = vmatmul.mubr.msk.f32.vlgmr.msra.gmra.mxu1 %vm302_vm9, %v291_v53 }
 0x27e   :  { %v372_v60 = vpop.f32.mrf.mxu1 }
 0x27f   :  { %v373_v61 = vadd.f32 %v372_v60, %v301_v59 }
 0x280   :  { %v459_v62 = vpop.f32.mrf.mxu1 }
 0x281   :  { %376 = vst [vmem:[#allocation6] sm:$0x1] %v373_v61 }
 0x282   :  { %500 = shalt.err (!%p497_p9)
}
 0x283   :  { %386 = dma.vmem_to_hbm [thread:$0]  %s384_s8, 16, %s621_s7, [#allocation5]  }
 0x284   :  { %511 = dma.done.wait [#allocation5], 16  }
 0x285   :  { %512 = vsyncadd [#allocation5], 4294967280 }
 0x286   :  { %390 = vsyncpa [#allocation4], 1 }
 0x287   :  { %391 = vsyncpa [#allocation5], 1 }

</bundles_post_ra>
